<compile_context>
chip_gen: v7x
topology: tpu7x:2x2x1
jax: 0.10.0
libtpu: 0.0.40
codegen_flags: <defaults>
</compile_context>

<pallas_src>
import functools

import jax
import jax.numpy as jnp
from jax.experimental import pallas as pl
from jax.experimental.pallas import tpu as pltpu


def _cdiv(a, b):
    return -(-a // b)


def _round_up(a, m):
    return _cdiv(a, m) * m


def _vmem_capacity_bytes():
    """Physical VMEM of the local TPU; conservative (v7x-sized) fallback."""
    try:
        return int(pltpu.get_tpu_info().vmem_capacity_bytes)
    except Exception:
        return 64 * 1024 * 1024


def _split_k(K, max_tile):
    """Split the reduction dim into <=max_tile, 128-aligned tiles.

    Returns (tk, K_pad) with K_pad a multiple of tk (>= K). When K fits in a
    single tile we use tk == K exactly (full-dim block) so no padding at all.
    `max_tile` must be a multiple of 128.
    """
    if K <= max_tile:
        return K, K
    K_a = _round_up(K, 128)
    n_blocks = _cdiv(K_a, max_tile)
    tk = _round_up(_cdiv(K_a, n_blocks), 128)
    return tk, _cdiv(K, tk) * tk


def _weight_spec(block_shape, index_map, deep):
    """Weight BlockSpec; 3-deep pipeline for small-M weight-streaming shapes."""
    if deep:
        try:
            return pl.BlockSpec(block_shape, index_map,
                                pipeline_mode=pl.Buffered(3))
        except TypeError:  # older BlockSpec without pipeline_mode
            pass
    return pl.BlockSpec(block_shape, index_map)


def _linear_kernel(x_ref, w_ref, b_ref, o_ref, acc_ref, *, precision):
    """One (tm, tn) output tile, reducing over the K grid axis (last grid dim).

    x_ref: (tm, tk) original input dtype (e.g. bf16)
    w_ref: (tk, tn) compute dtype (bf16 by default)
    b_ref: (1, tn)  compute dtype
    o_ref: (tm, tn) original input dtype
    acc_ref: (tm, tn) f32 accumulator scratch
    """
    k = pl.program_id(2)

    @pl.when(k == 0)
    def _():
        # Bias-initialize the accumulator: removes the separate epilogue add.
        acc_ref[...] = jnp.broadcast_to(
            b_ref[...].astype(jnp.float32), acc_ref.shape)

    # Matches PyTorch's data.to(self.projector.weight.dtype).
    x = x_ref[...].astype(w_ref.dtype)
    acc_ref[...] += jnp.dot(x, w_ref[...],
                            preferred_element_type=jnp.float32,
                            precision=precision)

    @pl.when(k == pl.num_programs(2) - 1)
    def _():
        # Matches result.to(original_dtype).
        o_ref[...] = acc_ref[...].astype(o_ref.dtype)


def _linear_kernel_single_k(x_ref, w_ref, b_ref, o_ref, *, precision):
    """Whole-K-in-one-tile fast path: no accumulator scratch round trip."""
    x = x_ref[...].astype(w_ref.dtype)
    acc = jnp.dot(x, w_ref[...], preferred_element_type=jnp.float32,
                  precision=precision)
    o_ref[...] = (acc + b_ref[...].astype(jnp.float32)).astype(o_ref.dtype)


@functools.partial(jax.jit, static_argnames=("compute_dtype", "_tile_caps"))
def liner_projector_forward(x, weight, bias, *, compute_dtype=jnp.bfloat16,
                            _tile_caps=None):
    """LinerProjector.forward: y = (x.to(w.dtype) @ W + b).to(x.dtype).

    x:      (..., in_features)
    weight: (in_features, out_features)  (transposed vs. torch's (out, in))
    bias:   (out_features,)

    compute_dtype:
      jnp.bfloat16 (default, recommended): weight/bias cast once in the
        wrapper -> native bf16 MXU path + half the weight HBM traffic,
        accumulation stays f32.
      None: strict PyTorch numerics — matmul in the stored weight dtype; f32
        weights use Precision.HIGHEST (true f32 matmul, not the truncated
        default).
    _tile_caps: optional (tm_cap, tn_cap, tk_cap) override (testing knob).
    """
    orig_dtype = x.dtype
    orig_shape = x.shape
    K, N = weight.shape
    assert orig_shape[-1] == K, (orig_shape, weight.shape)

    M = 1
    for d in orig_shape[:-1]:
        M *= d
    x2d = x.reshape(M, K)

    if compute_dtype is not None:
        weight = weight.astype(compute_dtype)
        bias = bias.astype(compute_dtype)
    w_dtype = weight.dtype
    # Without an explicit precision, f32 MXU matmuls are silently truncated;
    # if the user asked for f32 weights, deliver real f32 accuracy.
    precision = (jax.lax.Precision.HIGHEST
                 if w_dtype == jnp.float32 else None)

    x_bytes = jnp.dtype(orig_dtype).itemsize
    w_bytes = jnp.dtype(w_dtype).itemsize
    o_bytes = x_bytes

    # ---- generation-aware tile caps / VMEM budget ----------------------------
    vmem_cap = _vmem_capacity_bytes()
    big_vmem = vmem_cap >= 100 * 1024 * 1024   # v5e/v6e: 128 MiB; v7x: 64 MiB
    tm_cap = 512 if big_vmem else 256
    tn_cap = 1024 if big_vmem else 512
    tk_cap = 2048
    w_slab_budget = (16 if big_vmem else 8) * 1024 * 1024   # per weight buffer
    vmem_clamp = (100 if big_vmem else 48) * 1024 * 1024

    if _tile_caps is not None:
        tm_cap, tn_cap, tk_cap = _tile_caps
    tm_cap = max(int(tm_cap), 8)
    tn_cap = max((int(tn_cap) // 128) * 128, 128)
    tk_cap = max((int(tk_cap) // 128) * 128, 128)

    # tn first (lane-dense stores; cuts x HBM re-reads), then tm, then tk.
    tn = min(_round_up(N, 128), tn_cap)
    tm = min(_round_up(M, 8), tm_cap)
    tk_max = max(128, min(tk_cap, (w_slab_budget // (tn * w_bytes)) // 128 * 128))
    tk, K_pad = _split_k(K, tk_max)

    grid_m = _cdiv(M, tm)
    grid_n = _cdiv(N, tn)
    grid_k = K_pad // tk

    # Only the K reduction tail needs zero padding (uninitialized K-tail data
    # would contaminate valid outputs); M/N edge blocks are handled by Pallas.
    if K_pad != K:
        x2d = jnp.pad(x2d, ((0, 0), (0, K_pad - K)))
        weight = jnp.pad(weight, ((0, K_pad - K), (0, 0)))
    b2d = bias.reshape(1, N)

    # ---- VMEM footprint (incl. in-kernel temps) + explicit limit -------------
    deep_w = (grid_m == 1) and (grid_n * grid_k >= 3)
    w_bufs = 3 if deep_w else 2
    vmem_needed = (
        2 * tm * tk * x_bytes          # x input tiles (double-buffered)
        + w_bufs * tk * tn * w_bytes   # weight tiles
        + 2 * 8 * tn * w_bytes         # bias tiles (sublane-padded)
        + 2 * tm * tn * o_bytes        # output tiles
        + tm * tn * 4                  # f32 accumulator scratch
        + tm * tk * w_bytes            # in-kernel x.astype(w_dtype) temp
        + tm * tn * 4                  # in-kernel f32 epilogue temp
    )
    vmem_limit = int(min(vmem_clamp,
                         max(32 * 1024 * 1024, vmem_needed + 8 * 1024 * 1024)))

    # ---- pallas_call ----------------------------------------------------------
    if grid_k == 1:
        kernel = functools.partial(_linear_kernel_single_k, precision=precision)
        grid = (grid_m, grid_n)
        in_specs = [
            pl.BlockSpec((tm, tk), lambda i, j: (i, 0)),            # x tile
            _weight_spec((tk, tn), lambda i, j: (0, j), deep_w),    # weight tile
            pl.BlockSpec((1, tn), lambda i, j: (0, j)),             # bias tile
        ]
        out_specs = pl.BlockSpec((tm, tn), lambda i, j: (i, j))
        scratch_shapes = []
        dim_sem = ("parallel", "parallel")
    else:
        kernel = functools.partial(_linear_kernel, precision=precision)
        grid = (grid_m, grid_n, grid_k)
        in_specs = [
            pl.BlockSpec((tm, tk), lambda i, j, k: (i, k)),          # x tile
            _weight_spec((tk, tn), lambda i, j, k: (k, j), deep_w),  # weight tile
            pl.BlockSpec((1, tn), lambda i, j, k: (0, j)),           # bias tile
        ]
        out_specs = pl.BlockSpec((tm, tn), lambda i, j, k: (i, j))
        scratch_shapes = [pltpu.VMEM((tm, tn), jnp.float32)]
        dim_sem = ("parallel", "parallel", "arbitrary")

    out = pl.pallas_call(
        kernel,
        out_shape=jax.ShapeDtypeStruct((M, N), orig_dtype),
        grid_spec=pltpu.PrefetchScalarGridSpec(
            num_scalar_prefetch=0,
            grid=grid,
            in_specs=in_specs,
            out_specs=out_specs,
            scratch_shapes=scratch_shapes,
        ),
        compiler_params=pltpu.CompilerParams(
            # TODO(synk): on v7x, if profiling shows single-TensorCore
            # occupancy, mark axis 0 pltpu.CORE_PARALLEL to split across TCs.
            dimension_semantics=dim_sem,
            vmem_limit_bytes=vmem_limit,
        ),
    )(x2d, weight, b2d)

    return out.reshape(*orig_shape[:-1], N)


def init_linear_params(key, in_features, out_features, dtype=jnp.float32):
    """Deterministic init matching nn.Linear: U(-1/sqrt(in), 1/sqrt(in))."""
    kw, kb = jax.random.split(key)
    bound = 1.0 / (in_features ** 0.5)
    # Stored as (in_features, out_features) so the kernel computes x @ W + b.
    weight = jax.random.uniform(
        kw, (in_features, out_features), dtype=dtype, minval=-bound, maxval=bound
    )
    bias = jax.random.uniform(
        kb, (out_features,), dtype=dtype, minval=-bound, maxval=bound
    )
    return weight, bias


# TODO(synk): torch.load(ckpt_path) checkpoint loading and freeze/requires_grad are
# training/IO concerns with no kernel-level equivalent; only forward() is implemented.

if __name__ == "__main__":
    key = jax.random.PRNGKey(0)
    k_x, k_p, k_x2, k_p2 = jax.random.split(key, 4)

    # --- main test: shapes implied by the module (bf16 activations, f32 params) ---
    batch, seq = 2, 8
    in_features, out_features = 128, 256

    x = jax.random.normal(k_x, (batch, seq, in_features), dtype=jnp.bfloat16)
    weight, bias = init_linear_params(k_p, in_features, out_features, jnp.float32)
    ref = (x.astype(jnp.float32) @ weight + bias).astype(x.dtype)

    # Default (recommended) bf16 MXU path, f32 accumulation.
    y = jax.block_until_ready(liner_projector_forward(x, weight, bias))
    assert y.shape == (batch, seq, out_features)
    assert y.dtype == x.dtype
    assert jnp.allclose(y.astype(jnp.float32), ref.astype(jnp.float32),
                        atol=6e-2, rtol=6e-2)

    # Strict PyTorch-numerics path (matmul in stored weight dtype = f32,
    # Precision.HIGHEST), tight tolerance.
    y_f32 = jax.block_until_ready(
        liner_projector_forward(x, weight, bias, compute_dtype=None))
    assert y_f32.shape == (batch, seq, out_features)
    assert y_f32.dtype == x.dtype
    assert jnp.allclose(y_f32.astype(jnp.float32), ref.astype(jnp.float32),
                        atol=1e-2, rtol=1e-2)

    # --- ragged-shape / tiled-grid test: forces M & N edge blocks, a zero-padded
    #     K tail and a multi-step K reduction (bias-initialized accumulator).
    b2, s2, k2, n2 = 2, 7, 200, 200
    x2 = jax.random.normal(k_x2, (b2, s2, k2), dtype=jnp.bfloat16)
    w2, bi2 = init_linear_params(k_p2, k2, n2, jnp.float32)
    y2 = jax.block_until_ready(
        liner_projector_forward(x2, w2, bi2, _tile_caps=(8, 128, 128)))
    ref2 = (x2.astype(jnp.float32) @ w2 + bi2).astype(x2.dtype)
    assert y2.shape == (b2, s2, n2)
    assert y2.dtype == x2.dtype
    assert jnp.allclose(y2.astype(jnp.float32), ref2.astype(jnp.float32),
                        atol=6e-2, rtol=6e-2)

    print("KERNEL_OK")
</pallas_src>

<mosaic_0001>
module attributes {stable_mosaic.version = 11 : i64} {
  func.func @_linear_kernel_single_k(%arg0: i32, %arg1: i32, %arg2: memref<16x128xbf16, #tpu.memory_space<vmem>>, %arg3: memref<128x256xbf16, #tpu.memory_space<vmem>>, %arg4: memref<1x256xbf16, #tpu.memory_space<vmem>>, %arg5: memref<16x256xbf16, #tpu.memory_space<vmem>>) attributes {dimension_semantics = [#tpu.dimension_semantics<parallel>, #tpu.dimension_semantics<parallel>], iteration_bounds = array<i64: 1, 1>, scalar_prefetch = 0 : i64, scratch_operands = 0 : i64, tpu.core_type = #tpu.core_type<tc>, window_params = [{transform_indices = @transform_0, window_bounds = array<i64: 16, 128>}, {transform_indices = @transform_1, window_bounds = array<i64: 128, 256>}, {transform_indices = @transform_2, window_bounds = array<i64: 1, 256>}, {transform_indices = @transform_3, window_bounds = array<i64: 16, 256>}]} {
    %c0 = arith.constant 0 : index
    %c0_0 = arith.constant 0 : index
    %0 = vector.load %arg2[%c0, %c0_0] : memref<16x128xbf16, #tpu.memory_space<vmem>>, vector<16x128xbf16>
    %c0_1 = arith.constant 0 : index
    %c0_2 = arith.constant 0 : index
    %1 = vector.load %arg3[%c0_1, %c0_2] : memref<128x256xbf16, #tpu.memory_space<vmem>>, vector<128x256xbf16>
    %cst = arith.constant dense<0.000000e+00> : vector<16x256xf32>
    %2 = tpu.matmul %0, %1, %cst {dimension_numbers = #tpu.dot_dimension_numbers<[1], [0], [0], [1], [0, 0, 1, 1], [], []>} : vector<16x128xbf16>, vector<128x256xbf16>, vector<16x256xf32> -> vector<16x256xf32>
    %c0_3 = arith.constant 0 : index
    %c0_4 = arith.constant 0 : index
    %3 = vector.load %arg4[%c0_3, %c0_4] : memref<1x256xbf16, #tpu.memory_space<vmem>>, vector<1x256xbf16>
    %4 = arith.extf %3 : vector<1x256xbf16> to vector<1x256xf32>
    %5 = vector.broadcast %4 : vector<1x256xf32> to vector<16x256xf32>
    %6 = arith.addf %2, %5 : vector<16x256xf32>
    %7 = arith.truncf %6 : vector<16x256xf32> to vector<16x256xbf16>
    %c0_5 = arith.constant 0 : index
    %c0_6 = arith.constant 0 : index
    %8 = vector.load %arg5[%c0_5, %c0_6] : memref<16x256xbf16, #tpu.memory_space<vmem>>, vector<16x256xbf16>
    tpu.vector_store %arg5[%c0_5, %c0_6], %7 {strides = array<i32>} : memref<16x256xbf16, #tpu.memory_space<vmem>>, vector<16x256xbf16>,
    return
  }
  func.func @transform_0(%arg0: i32, %arg1: i32) -> (i32, i32) {
    %c0_i32 = arith.constant 0 : i32
    %c0_i32_0 = arith.constant 0 : i32
    return %arg0, %c0_i32 : i32, i32
  }
  func.func @transform_1(%arg0: i32, %arg1: i32) -> (i32, i32) {
    %c0_i32 = arith.constant 0 : i32
    %c0_i32_0 = arith.constant 0 : i32
    return %c0_i32, %arg1 : i32, i32
  }
  func.func @transform_2(%arg0: i32, %arg1: i32) -> (i32, i32) {
    %c0_i32 = arith.constant 0 : i32
    %c0_i32_0 = arith.constant 0 : i32
    return %c0_i32, %arg1 : i32, i32
  }
  func.func @transform_3(%arg0: i32, %arg1: i32) -> (i32, i32) {
    %c0_i32 = arith.constant 0 : i32
    return %arg0, %arg1 : i32, i32
  }
}

</mosaic_0001>

<bundles_post_ra>
// kernel: liner_projector_forward.1
= control target key start
LH: loop header
LB: loop body
LE: loop exit
PB: predicated region body
PF: predicated region fallthrough
CT: control target
= control target key end

     0   :  { %v288_v2 = vmov 0   ;;  %s378_s0 = inlined_call_operand.vmem [shape: bf16[16,128], index: 0, kind: input, shape index: {}]   ;;  %s379_s1 = inlined_call_operand.vmem [shape: bf16[128,256], index: 1, kind: input, shape index: {}]   ;;  %s380_s2 = inlined_call_operand.vmem [shape: bf16[1,256], index: 2, kind: input, shape index: {}]   ;;  %s381_s3 = inlined_call_operand.hbm [shape: bf16[16,256], index: 3, kind: output, shape index: {}]  }
   0x1   :  { %v239_v0 = vld [vmem:[%s379_s1 + $0x4] ss:$8 sps:$4 sm:$0xff]   ;;  %v241_v1 = vld [vmem:[%s379_s1] ss:$8 sps:$4 sm:$0xff]   ;;  %173 = vmatprep.mubr.bf16.mxu0 %v288_v2  ;;  %v242_v3 = vld [vmem:[%s379_s1 + $0x14] ss:$8 sps:$4 sm:$0xff]  }
   0x2   :  { %141 = vmatprep.subr.bf16.mxu0 %v239_v0  ;;  %v244_v4 = vld [vmem:[%s379_s1 + $0x10] ss:$8 sps:$4 sm:$0xff]   ;;  %v245_v5 = vld [vmem:[%s379_s1 + $0x24] ss:$8 sps:$4 sm:$0xff]   ;;  %v247_v6 = vld [vmem:[%s379_s1 + $0x20] ss:$8 sps:$4 sm:$0xff]  }
   0x3   :  { %142 = vmatpush1.bf16.msra.mxu0 %v241_v1  ;;  %v248_v7 = vld [vmem:[%s379_s1 + $0x34] ss:$8 sps:$4 sm:$0xff]   ;;  %v250_v8 = vld [vmem:[%s379_s1 + $0x30] ss:$8 sps:$4 sm:$0xff]   ;;  %v251_v9 = vld [vmem:[%s379_s1 + $0x44] ss:$8 sps:$4 sm:$0xff]  }
   0x4   :  { %143 = vmatprep.subr.bf16.mxu0 %v242_v3 }
   0x7   :  { %144 = vmatpush1.bf16.msra.mxu0 %v244_v4 }
   0x8   :  { %145 = vmatprep.subr.bf16.mxu0 %v245_v5 }
   0xb   :  { %146 = vmatpush1.bf16.msra.mxu0 %v247_v6 }
   0xc   :  { %147 = vmatprep.subr.bf16.mxu0 %v248_v7 }
   0xd   :  { %8 = vsyncpa [#allocation3], 0  ;;  %v253_v10 = vld [vmem:[%s379_s1 + $0x40] ss:$8 sps:$4 sm:$0xff]   ;;  %v254_v11 = vld [vmem:[%s379_s1 + $0x54] ss:$8 sps:$4 sm:$0xff]   ;;  %v37_v18 = vlaneseq }
   0xe   :  { %v256_v12 = vld [vmem:[%s379_s1 + $0x50] ss:$8 sps:$4 sm:$0xff]   ;;  %v257_v13 = vld [vmem:[%s379_s1 + $0x64] ss:$8 sps:$4 sm:$0xff]   ;;  %v259_v14 = vld [vmem:[%s379_s1 + $0x60] ss:$8 sps:$4 sm:$0xff]  }
   0xf   :  { %148 = vmatpush1.bf16.msra.mxu0 %v250_v8  ;;  %v260_v15 = vld [vmem:[%s379_s1 + $0x74] ss:$8 sps:$4 sm:$0xff]   ;;  %v262_v16 = vld [vmem:[%s379_s1 + $0x70] ss:$8 sps:$4 sm:$0xff]   ;;  %v263_v17 = vld [vmem:[%s378_s0] sm:$0xff]   ;;  %v38_v19 = vshrl.u32 %v37_v18, 7 }
  0x10   :  { %149 = vmatprep.subr.bf16.mxu0 %v251_v9  ;;  %v34_v20 = vld [vmem:[%s380_s2] sm:$0x3]  ;;  %s289_s0 = smov [#allocation2]  }
  0x11   :  { %v35_v21 = vunpack.c.l.bf16 %v34_v20  ;;  %v39_v22 = vsub.s32 0, %v38_v19  ;;  %v43_v23 = vsub.s32 2, %v38_v19  ;;  %s203_s1 = sshll.u32 %s289_s0, 4  ;;  %s204_s1 = int_to_ptr.vmem [resolvable:$true] %s203_s1 }
  0x12   :  { %s264_s2 = scalar_lea.vmem %s204_s1, 256  ;;  %p269_p1 = scmp.lt.s32.totalorder %s204_s1, %s204_s1 }
  0x13   :  { %150 = vmatpush1.bf16.msra.mxu0 %v253_v10  ;;  %v40_v24 = vrot.slane %v35_v21, %v39_v22  ;;  %v44_v25 = vrot.slane %v35_v21, %v43_v23  ;;  %p265_p0 = scmp.ne.s32.totalorder %s204_s1, %s264_s2  ;;  %p270_p2 = scmp.lt.s32.totalorder %s264_s2, %s264_s2 }
  0x14   :  { %151 = vmatprep.subr.bf16.mxu0 %v254_v11 }
  0x15   :  { %v50_v26 = vrot.slane %v40_v24, %v39_v22  ;;  %v54_v27 = vrot.slane %v44_v25, %v39_v22  ;;  %p271_p3 = por %p270_p2, %p269_p1 }
  0x17   :  { %152 = vmatpush1.bf16.msra.mxu0 %v256_v12  ;;  %p272_p4 = pnand %p271_p3, %p265_p0 }
  0x18   :  { %153 = vmatprep.subr.bf16.mxu0 %v257_v13 }
  0x1b   :  { %154 = vmatpush1.bf16.msra.mxu0 %v259_v14 }
  0x1c   :  { %155 = vmatprep.subr.bf16.mxu0 %v260_v15 }
  0x1f   :  { %156 = vmatpush1.bf16.msra.mxu0 %v262_v16 }
  0x22   :  { %174 = vmatmul.mubr.bf16.vlgmr.msra.gmra.mrb[0].mxu0 %v263_v17 }
  0xf5   :  { %v175_v28 = vpop.f32.mrb[0].mxu0 }
  0xf6   :  { %v176_v29 = vadd.f32 %v175_v28, %v50_v26  ;;  %v177_v30 = vpop.f32.mrb[1].mxu0 }
  0xf7   :  { %v178_v31 = vadd.f32 %v177_v30, %v54_v27  ;;  %v179_v32 = vpop.f32.mrb[2].mxu0 }
  0xf8   :  { %v180_v33 = vadd.f32 %v179_v32, %v50_v26  ;;  %v181_v34 = vpop.f32.mrb[3].mxu0 }
  0xf9   :  { %v233_v35 = vpack.c.bf16 %v178_v31, %v176_v29  ;;  %v182_v36 = vadd.f32 %v181_v34, %v54_v27 }
  0xfb   :  { %196 = vst [vmem:[#allocation2] sm:$0xff] %v233_v35  ;;  %v234_v37 = vpack.c.bf16 %v182_v36, %v180_v33 }
  0xfd   :  { %197 = vst [vmem:[#allocation2 + $0x8] sm:$0xff] %v234_v37 }
  0xfe   :  { %275 = shalt.err (!%p272_p4)
}
  0xff   :  { %s276_s23 = scalar_lea.hbm %s381_s3, 256 }
 0x100   :  { %p277_p5 = scmp.ne.s32.totalorder %s381_s3, %s276_s23  ;;  %p280_p6 = scmp.lt.u32.totalorder %s276_s23, %s381_s3 }
 0x102   :  { %p282_p7 = pnand %p280_p6, %p277_p5 }
 0x104   :  { %285 = shalt.err (!%p282_p7)
}
 0x105   :  { %s290_s28 = smov 128   ;;  %s291_s29 = smov 8  }
 0x106   :  { %209 = dma.vmem_to_hbm [thread:$0]  %s204_s1, 256, %s381_s3, [#allocation3], %s290_s28, %s290_s28, %s291_s29  }
 0x107   :  { %286 = dma.done.wait [#allocation3], 256  }
 0x108   :  { %287 = vsyncadd [#allocation3], 4294967040 }
 0x109   :  { %213 = vsyncpa [#allocation3], 1 }

</bundles_post_ra>
